<compile_context>
chip_gen: v5e
topology: v5e:2x2
jax: 0.10.0
libtpu: 0.0.40
codegen_flags: <defaults>
</compile_context>

<pallas_src>
import jax
import jax.numpy as jnp
from jax.experimental import pallas as pl
from jax.experimental.pallas import tpu as pltpu


# ----------------------------------------------------------------------------- kernels
def _lm_head_kernel_acc(h_ref, w_ref, o_ref, acc_ref):
    """Multi-K-step path: f32 accumulator resident across the K (last) grid axis."""
    @pl.when(pl.program_id(3) == 0)
    def _():
        acc_ref[...] = jnp.zeros_like(acc_ref)

    # logits += h @ W^T : contract the n_embd dim of both operands (NT matmul -> MXU).
    acc_ref[...] += jax.lax.dot_general(
        h_ref[...],
        w_ref[...],
        dimension_numbers=(((1,), (1,)), ((), ())),
        preferred_element_type=jnp.float32,
    )

    @pl.when(pl.program_id(3) == pl.num_programs(3) - 1)
    def _():
        o_ref[...] = acc_ref[...].astype(o_ref.dtype)


def _lm_head_kernel_single(h_ref, w_ref, o_ref):
    """Single-K-step fast path: no accumulator scratch, no init/copy passes."""
    o_ref[...] = jax.lax.dot_general(
        h_ref[...],
        w_ref[...],
        dimension_numbers=(((1,), (1,)), ((), ())),
        preferred_element_type=jnp.float32,
    ).astype(o_ref.dtype)


# ----------------------------------------------------------------------------- helpers
def _round_up(x, m):
    return -(-x // m) * m


def _tpu_defaults():
    """Generation-aware (tile_m, tile_n, tile_k, vmem_budget_bytes)."""
    kind = ""
    vmem_cap = 128 * 1024 * 1024
    try:
        kind = jax.devices()[0].device_kind.lower()
    except Exception:
        pass
    try:
        vmem_cap = int(getattr(pltpu.get_tpu_info(), "vmem_capacity_bytes", vmem_cap))
    except Exception:
        pass

    if ("v5e" in kind) or ("v5 lite" in kind) or ("v5lite" in kind):
        # v5e: 197 TF/s vs ~0.82 TB/s -> tm=tn=512 already clears the ~240 threshold.
        return 512, 512, 1024, 64 * 1024 * 1024
    if vmem_cap <= 64 * 1024 * 1024:
        # v7x: 64 MiB per TensorCore -> keep total buffers <= ~52 MiB.
        return 1024, 2048, 1024, 52 * 1024 * 1024
    # v6e (or unknown 128 MiB part): big tiles, ~100 MiB budget.
    return 2048, 2048, 1024, 100 * 1024 * 1024


def _pick_tk(k, tile_k):
    """Reduction tile: must divide n_embd exactly and be 128-aligned (or full-K)."""
    if k <= tile_k:
        return k
    for cand in (tile_k, 1024, 512, 256, 128):
        if cand <= tile_k and cand % 128 == 0 and k % cand == 0:
            return cand
    return k  # no aligned divisor -> single full-K step


def _pick_tm(tile_m, s, sm):
    """tm must be 8-aligned OR span the full h seq dim AND the full output seq dim."""
    if sm >= tile_m:
        return tile_m
    if sm % 8 == 0 or sm == s:
        return sm
    return _round_up(sm, 8)  # ragged boundary block; extra rows land in discarded output


# ----------------------------------------------------------------------------- wrapper
def lm_head(h, weight, *, trunc_and_reshape=True, tile_m=None, tile_n=None, tile_k=None,
            compute_dtype=None, out_dtype=None):
    """lm_logits = (h[:, :-1] flattened) @ weight.T  (no bias), matching LMHead.forward."""
    n_embd = h.shape[-1]
    vocab, k_w = weight.shape
    assert k_w == n_embd, (weight.shape, n_embd)

    # Normalize to 3-D (B, S, D) WITHOUT materializing a truncated copy; the [:, :-1]
    # truncation is realized by giving the output only S-1 rows per batch in the grid.
    if trunc_and_reshape:
        assert h.ndim == 3, "trunc_and_reshape=True expects h of shape (B, S, n_embd)"
        h3 = h
        b, s, _ = h3.shape
        sm = s - 1
    else:
        h3 = h.reshape(1, -1, n_embd)  # free row-major reshape, no copy
        b, s, _ = h3.shape
        sm = s

    # Optional bf16 compute (MXU-native on v6e/v7x, halves HBM traffic on re-reads).
    if compute_dtype is not None and jnp.dtype(compute_dtype) != jnp.dtype(h3.dtype):
        h3 = h3.astype(compute_dtype)
        weight = weight.astype(compute_dtype)
    out_dtype = out_dtype if out_dtype is not None else h.dtype

    in_bytes = jnp.dtype(h3.dtype).itemsize
    out_bytes = jnp.dtype(out_dtype).itemsize

    d_tm, d_tn, d_tk, budget = _tpu_defaults()
    tile_m = _round_up(tile_m if tile_m is not None else d_tm, 8)
    tile_n = _round_up(tile_n if tile_n is not None else d_tn, 128)
    tile_k = tile_k if tile_k is not None else d_tk

    tm = _pick_tm(tile_m, s, sm)
    tn = min(tile_n, vocab)          # == vocab (full dim) or a 128-multiple: always legal
    tk = _pick_tk(n_embd, tile_k)
    # Ragged K would silently corrupt the accumulation -- guard any future override.
    assert n_embd % tk == 0, f"tk={tk} must divide n_embd={n_embd}"

    nk = n_embd // tk
    multi_k = nk > 1

    # VMEM fit (double-buffered h/W/out tiles + optional f32 accumulator).
    def _vmem_need(tm_, tn_):
        acc = tm_ * tn_ * 4 if multi_k else 0
        return (2 * tm_ * tk * in_bytes + 2 * tn_ * tk * in_bytes
                + 2 * tm_ * tn_ * out_bytes + acc)

    while _vmem_need(tm, tn) > budget and max(tm, tn) > 256:
        if tn >= tm:
            tn = max(128, _round_up(tn // 2, 128))
        else:
            tm = max(8, _round_up(tm // 2, 8))

    nm = pl.cdiv(sm, tm)
    nn = pl.cdiv(vocab, tn)
    grid = (b, nm, nn, nk)

    kernel = _lm_head_kernel_acc if multi_k else _lm_head_kernel_single
    scratch = (pltpu.VMEM((tm, tn), jnp.float32),) if multi_k else ()

    m_rows = b * sm
    cost = pl.CostEstimate(
        flops=2 * m_rows * vocab * n_embd,
        transcendentals=0,
        bytes_accessed=(m_rows * n_embd * in_bytes
                        + vocab * n_embd * in_bytes
                        + m_rows * vocab * out_bytes),
    )

    vmem_limit = int(max(_vmem_need(tm, tn) + (8 << 20), 32 << 20))

    out3 = pl.pallas_call(
        kernel,
        out_shape=jax.ShapeDtypeStruct((b, sm, vocab), out_dtype),
        grid_spec=pltpu.PrefetchScalarGridSpec(
            num_scalar_prefetch=0,
            grid=grid,
            in_specs=[
                # h tile: batch squeezed; never needs the truncated copy -- boundary rows
                # beyond sm only feed output rows that Pallas discards.
                pl.BlockSpec((None, tm, tk), lambda bb, i, j, kk: (bb, i, kk)),
                # W tile (vocab-major, contracted on its n_embd dim -> NT matmul).
                pl.BlockSpec((tn, tk), lambda bb, i, j, kk: (j, kk)),
            ],
            out_specs=pl.BlockSpec((None, tm, tn), lambda bb, i, j, kk: (bb, i, j)),
            scratch_shapes=scratch,
        ),
        compiler_params=pltpu.CompilerParams(
            dimension_semantics=("parallel", "parallel", "parallel", "arbitrary"),
            vmem_limit_bytes=vmem_limit,
        ),
        cost_estimate=cost,
    )(h3, weight)

    # (B, sm, V) -> (B*sm, V) is a free row-major reshape (matches .view(-1, n_embd) @ W.T).
    return out3.reshape(b * sm, vocab)


# ----------------------------------------------------------------------------- demo
if __name__ == "__main__":
    key = jax.random.PRNGKey(0)
    k1, k2, k3, k4 = jax.random.split(key, 4)

    # Test 1: single-K fast path, truncation folded into the grid (no h copy).
    batch, seq, n_embd, vocab = 2, 8, 32, 64
    h = jax.random.normal(k1, (batch, seq, n_embd), dtype=jnp.float32)
    w = 0.02 * jax.random.normal(k2, (vocab, n_embd), dtype=jnp.float32)  # tied embed weight
    logits = jax.block_until_ready(lm_head(h, w, trunc_and_reshape=True))
    ref = h[:, :-1].reshape(-1, n_embd) @ w.T
    assert logits.shape == (batch * (seq - 1), vocab), logits.shape
    assert jnp.allclose(logits, ref, atol=1e-2, rtol=1e-2), "mismatch (single-K path)"

    # Test 2: multi-K accumulator path (tk forced to 128 so nk > 1).
    n_embd2, vocab2 = 256, 384
    h2 = jax.random.normal(k3, (batch, seq, n_embd2), dtype=jnp.float32)
    w2 = 0.02 * jax.random.normal(k4, (vocab2, n_embd2), dtype=jnp.float32)
    logits2 = jax.block_until_ready(lm_head(h2, w2, trunc_and_reshape=True, tile_k=128))
    ref2 = h2[:, :-1].reshape(-1, n_embd2) @ w2.T
    assert logits2.shape == (batch * (seq - 1), vocab2), logits2.shape
    assert jnp.allclose(logits2, ref2, atol=1e-2, rtol=1e-2), "mismatch (multi-K path)"

    print("KERNEL_OK")
</pallas_src>

<mosaic_0001>
module attributes {stable_mosaic.version = 11 : i64} {
  func.func @_lm_head_kernel_single(%arg0: i32, %arg1: i32, %arg2: i32, %arg3: i32, %arg4: memref<1x8x32xf32, #tpu.memory_space<vmem>>, %arg5: memref<64x32xf32, #tpu.memory_space<vmem>>, %arg6: memref<1x8x64xf32, #tpu.memory_space<vmem>>) attributes {dimension_semantics = [#tpu.dimension_semantics<parallel>, #tpu.dimension_semantics<parallel>, #tpu.dimension_semantics<parallel>, #tpu.dimension_semantics<arbitrary>], iteration_bounds = array<i64: 2, 1, 1, 1>, scalar_prefetch = 0 : i64, scratch_operands = 0 : i64, tpu.core_type = #tpu.core_type<tc>, window_params = [{transform_indices = @transform_0, window_bounds = array<i64: 1, 8, 32>}, {transform_indices = @transform_1, window_bounds = array<i64: 64, 32>}, {transform_indices = @transform_2, window_bounds = array<i64: 1, 8, 64>}]} {
    %c0 = arith.constant 0 : index
    %c0_0 = arith.constant 0 : index
    %c0_1 = arith.constant 0 : index
    %0 = vector.load %arg4[%c0, %c0_0, %c0_1] : memref<1x8x32xf32, #tpu.memory_space<vmem>>, vector<1x8x32xf32>
    %1 = vector.shape_cast %0 : vector<1x8x32xf32> to vector<8x32xf32>
    %c0_2 = arith.constant 0 : index
    %c0_3 = arith.constant 0 : index
    %2 = vector.load %arg5[%c0_2, %c0_3] : memref<64x32xf32, #tpu.memory_space<vmem>>, vector<64x32xf32>
    %cst = arith.constant dense<0.000000e+00> : vector<8x64xf32>
    %3 = tpu.matmul %1, %2, %cst {dimension_numbers = #tpu.dot_dimension_numbers<[1], [1], [0], [0], [0, 0, 1, 0], [], []>} : vector<8x32xf32>, vector<64x32xf32>, vector<8x64xf32> -> vector<8x64xf32>
    %c0_4 = arith.constant 0 : index
    %c0_5 = arith.constant 0 : index
    %c0_6 = arith.constant 0 : index
    %4 = vector.load %arg6[%c0_4, %c0_5, %c0_6] : memref<1x8x64xf32, #tpu.memory_space<vmem>>, vector<1x8x64xf32>
    %5 = vector.shape_cast %4 : vector<1x8x64xf32> to vector<8x64xf32>
    %6 = vector.shape_cast %3 : vector<8x64xf32> to vector<1x8x64xf32>
    tpu.vector_store %arg6[%c0_4, %c0_5, %c0_6], %6 {strides = array<i32>} : memref<1x8x64xf32, #tpu.memory_space<vmem>>, vector<1x8x64xf32>,
    return
  }
  func.func @transform_0(%arg0: i32, %arg1: i32, %arg2: i32, %arg3: i32) -> (i32, i32, i32) {
    %c0_i32 = arith.constant 0 : i32
    return %arg0, %arg1, %arg3 : i32, i32, i32
  }
  func.func @transform_1(%arg0: i32, %arg1: i32, %arg2: i32, %arg3: i32) -> (i32, i32) {
    %c0_i32 = arith.constant 0 : i32
    return %arg2, %arg3 : i32, i32
  }
  func.func @transform_2(%arg0: i32, %arg1: i32, %arg2: i32, %arg3: i32) -> (i32, i32, i32) {
    %c0_i32 = arith.constant 0 : i32
    return %arg0, %arg1, %arg2 : i32, i32, i32
  }
}

</mosaic_0001>

<bundles_post_ra>
// kernel: tpu_custom_call.1
= control target key start
LH: loop header
LB: loop body
LE: loop exit
PB: predicated region body
PF: predicated region fallthrough
CT: control target
= control target key end

     0   :  { %s489_s9 = smov 0   ;;  %s491_s10 = smov 0   ;;  %s555_s0 = inlined_call_operand.vmem [shape: f32[2,8,32], index: 0, kind: input, shape index: {}]   ;;  %s556_s1 = inlined_call_operand.vmem [shape: f32[64,32], index: 1, kind: input, shape index: {}]   ;;  %s557_s2 = inlined_call_operand.vmem [shape: f32[2,7,64], index: 2, kind: output, shape index: {}]  }
   0x1   :  { %s493_s11 = smov 0  }
   0x2 LB: > { %s38_s12 = sadd.s32 1, %s468_s10  ;;  %p412_p0 = scmp.ge.s32.totalorder %s472_s11, 1  ;;  %s472_s11 = sphi %s493_s11, %s12_s11   ;;  %s468_s10 = sphi %s491_s10, %s559_s10   ;;  %s464_s9 = sphi %s489_s9, %s558_s9  }
   0x3   : > { %p40_p1 = scmp.ge.s32.totalorder %s38_s12, 2  ;;  %p167_p2 = scmp.lt.s32.totalorder %s472_s11, 3 }
   0x5   : > { %s561_s12 = smov (%p40_p1, %s38_s12), 0  ;;  %p168_p3 = pnand %p412_p0, %p167_p2 }
   0x6   : > { %p207_p4 = scmp.lt.s32.totalorder (!%p168_p3), %s464_s9, 1 }
   0x7   : > { %171 = sbr.rel (%p168_p3) target bundleno = 171 (0xab), region = 28 }
   0xc   : > { %v244_v0 = vld [vmem:[%s556_s1 + $0x38] sm:$0xff]  ;;  %vm245_vm0 = vcmask 261120   ;;  %v243_v1 = vld [vmem:[%s556_s1 + $0x30] sm:$0xff]  ;;  %v242_v2 = vld [vmem:[%s556_s1 + $0x28] sm:$0xff]  ;;  %s563_s9 = smov (!%p207_p4, %s464_s9), 1  ;;  %vm293_vm1 = vcmask 523264  }
   0xd   : > { %415 = vmatpush.xpose.msk.msra.mxu0 %vm245_vm0, %v244_v0  ;;  %v241_v3 = vld [vmem:[%s556_s1 + $0x20] sm:$0xff]  ;;  %v240_v4 = vld [vmem:[%s556_s1 + $0x18] sm:$0xff]  ;;  %v239_v5 = vld [vmem:[%s556_s1 + $0x10] sm:$0xff]  ;;  %s413_s27 = sshll.u32 %s563_s9, 3 }
   0xe   : > { %v238_v6 = vld [vmem:[%s556_s1 + $0x8] sm:$0xff]  ;;  %v237_v7 = vld [vmem:[%s556_s1] sm:$0xff]  ;;  %s216_s4 = scalar_lea.vmem %s555_s0, %s413_s27  ;;  %s235_s7 = scalar_lea.vmem %s557_s2, %s413_s27 }
   0xf   : > { %v236_v8 = vld [vmem:[%s216_s4] sm:$0xff] }
  0x11   : > { %416 = vmatpush.xpose.msk.msra.mxu0 %vm245_vm0, %v243_v1 }
  0x15   : > { %417 = vmatpush.xpose.msk.msra.mxu0 %vm245_vm0, %v242_v2 }
  0x19   : > { %418 = vmatpush.xpose.msk.msra.mxu0 %vm245_vm0, %v241_v3 }
  0x1d   : > { %419 = vmatpush.xpose.msk.msra.mxu0 %vm245_vm0, %v240_v4 }
  0x21   : > { %420 = vmatpush.xpose.msk.msra.mxu0 %vm245_vm0, %v239_v5 }
  0x25   : > { %421 = vmatpush.xpose.msk.msra.mxu0 %vm245_vm0, %v238_v6 }
  0x29   : > { %422 = vmatpush.xpose.msk.msra.mxu0 %vm245_vm0, %v237_v7 }
  0x2c   : > { %423 = vmatmul.msk.f32.vlgmr.msra.gmra.mxu0 %vm245_vm0, %v236_v8 }
  0xa9   : > { %v290_v9 = vpop.f32.mrf.mxu0 }
  0xaa   : > { %294 = vst.msk [vmem:[%s235_s7] sm:$0xff] %vm293_vm1, %v290_v9 }
  0xab PF: > { %s12_s11 = sadd.s32 1, %s472_s11   ;;  %s558_s9 = smov %s468_s10 }
  0xac   : > { %p9_p5 = scmp.ge.s32.totalorder %s12_s11, 4   ;;  %s559_s10 = smov %s561_s12 }
  0xae   :  { %11 = sbr.rel (!%p9_p5) target bundleno = 2 (0x2), region = 61 }

</bundles_post_ra>
